<compile_context>
chip_gen: v5e
topology: v5e:2x2
jax: 0.10.0
libtpu: 0.0.40
codegen_flags: <defaults>
</compile_context>

<pallas_src>
import functools

import jax
import jax.numpy as jnp
from jax.experimental import pallas as pl
from jax.experimental.pallas import tpu as pltpu


def _focal_loss_kernel(x_ref, t_ref, out_ref, *, alpha, gamma, n_total, do_reduce):
    x = x_ref[...].astype(jnp.float32)                  # (TILE_N, C) f32
    tile_n, c = x.shape

    # Targets arrive lane-dense as a (1, 1, TILE_N) int32 row (contiguous,
    # unmasked DMA).  One XLU transpose restores the (TILE_N, 1) column used
    # by the per-row compare; it hides under the logits DMA.
    t = jnp.transpose(t_ref[...].reshape(1, tile_n))    # (TILE_N, 1) int32

    # Mask for padded rows (last partial block / N not a multiple of tile_n).
    row0 = pl.program_id(0) * tile_n
    rows = row0 + jax.lax.broadcasted_iota(jnp.int32, (tile_n, 1), 0)
    valid = rows < n_total                               # (TILE_N, 1) bool

    # --- cross entropy with reduction='none' (log-softmax + target gather) ---
    m = jnp.max(x, axis=-1, keepdims=True)                               # (TILE_N, 1)
    # TODO(synk): if a v7x bundle dump shows the single EUP (exp) as the
    # binding slot, this exp could run in bf16 with an f32 accumulate.
    lse = m + jnp.log(jnp.sum(jnp.exp(x - m), axis=-1, keepdims=True))   # (TILE_N, 1)

    class_ids = jax.lax.broadcasted_iota(jnp.int32, (tile_n, c), 1)      # (TILE_N, C)
    # Masked select-sum instead of an f32 one-hot materialization: one select,
    # one reduce -- no bool->f32 cast, no extra vmul, one fewer (TILE_N, C)
    # f32 intermediate, which leaves more VMEM for a bigger logit tile.
    tgt_logit = jnp.sum(jnp.where(class_ids == t, x, 0.0),
                        axis=-1, keepdims=True)                           # (TILE_N, 1)

    # Clamp: rounding can make lse - tgt_logit tiny-negative -> pt > 1 -> NaN pow.
    ce = jnp.maximum(lse - tgt_logit, 0.0)                                # (TILE_N, 1)

    # --- focal weighting ---
    pt = jnp.exp(-ce)
    base = 1.0 - pt
    g = float(gamma)
    if g == int(g) and 0 <= int(g) <= 8:
        # integer gamma (default 2): multiply chain, no log/exp on the EUP
        w = jnp.ones_like(base)
        for _ in range(int(g)):
            w = w * base
    else:
        w = base ** g
    f_loss = float(alpha) * w * ce                                        # (TILE_N, 1)
    f_loss = jnp.where(valid, f_loss, 0.0)               # zero padded / garbage rows

    if do_reduce:
        # One partial sum per block; the wrapper finishes with a tiny jnp.sum/N,
        # keeping the grid axis fully parallel (v7x 2-TC sharding stays legal).
        out_ref[...] = jnp.sum(f_loss, keepdims=True).reshape(1, 1, 1)
    else:
        # Lane-dense store: (TILE_N, 1) column -> (1, TILE_N) row.
        out_ref[...] = jnp.transpose(f_loss).reshape(1, 1, tile_n)


def _vmem_budget():
    """(max_dma_tile_bytes, max_f32_tile_bytes, vmem_limit_bytes), per generation."""
    try:
        vmem = int(pltpu.get_tpu_info().vmem_capacity_bytes)
    except Exception:
        vmem = 64 * 1024 * 1024          # conservative: v7x per-TensorCore VMEM
    if vmem >= 100 * 1024 * 1024:
        # v5e / v6e: 128 MiB physical VMEM -> big tiles, generous scoped limit.
        return 8 * 1024 * 1024, 12 * 1024 * 1024, 96 * 1024 * 1024
    # v7x: 64 MiB per TensorCore.  2x double-buffered input + ~4x tile of f32
    # intermediates must stay well under a ~48 MiB scoped limit.
    return 6 * 1024 * 1024, 6 * 1024 * 1024, 48 * 1024 * 1024


def _choose_tile_n(n, c, itemsize, *, max_dma_bytes, max_f32_bytes, max_rows=8192):
    """Row tile: multiple of 8, DMA-sized by the input's true itemsize, capped
    by the in-kernel f32 intermediate footprint and the (8-padded) problem size."""
    rows_dma = max_dma_bytes // max(1, c * itemsize)     # target HBM DMA per step
    rows_f32 = max_f32_bytes // max(1, c * 4)            # cap f32 intermediates
    rows = min(rows_dma, rows_f32, max_rows)
    rows = max(8, (rows // 8) * 8)
    n_pad8 = ((n + 7) // 8) * 8
    return min(rows, n_pad8)


def focal_loss(inputs, targets, *, alpha=1.0, gamma=2.0, reduce=True, _max_rows=8192):
    """Pallas TPU implementation of FocalLoss.forward (CrossEntropyLoss path).

    inputs:  (N, C) logits (any float dtype; cast to f32 inside the kernel)
    targets: (N,)   int class indices
    returns: scalar mean focal loss if reduce else (N,) per-sample losses
    _max_rows: test hook to force multiple grid blocks at small N.
    """
    n, c = inputs.shape
    itemsize = jnp.dtype(inputs.dtype).itemsize
    max_dma_bytes, max_f32_bytes, vmem_limit = _vmem_budget()
    tile_n = _choose_tile_n(n, c, itemsize, max_dma_bytes=max_dma_bytes,
                            max_f32_bytes=max_f32_bytes, max_rows=_max_rows)
    num_blocks = pl.cdiv(n, tile_n)
    n_pad = num_blocks * tile_n

    # Lane-dense, zero-padded targets: one contiguous int32 row per block.
    t = targets.astype(jnp.int32)
    if n_pad > n:
        t = jnp.pad(t, (0, n_pad - n))
    t3d = t.reshape(num_blocks, 1, tile_n)

    if reduce:
        out_shape = jax.ShapeDtypeStruct((num_blocks, 1, 1), jnp.float32)
        out_spec = pl.BlockSpec((1, 1, 1), lambda i: (i, 0, 0))
        out_bytes = num_blocks * 4
    else:
        out_shape = jax.ShapeDtypeStruct((num_blocks, 1, tile_n), jnp.float32)
        out_spec = pl.BlockSpec((1, 1, tile_n), lambda i: (i, 0, 0))
        out_bytes = n_pad * 4

    kernel = functools.partial(
        _focal_loss_kernel,
        alpha=float(alpha),
        gamma=float(gamma),
        n_total=n,
        do_reduce=bool(reduce),
    )

    cost = pl.CostEstimate(
        flops=8 * n * c,
        transcendentals=n * c + 2 * n,        # exp per logit + exp/log per row
        bytes_accessed=n * c * itemsize + n_pad * 4 + out_bytes,
    )

    out = pl.pallas_call(
        kernel,
        out_shape=out_shape,
        grid=(num_blocks,),
        in_specs=[
            pl.BlockSpec((tile_n, c), lambda i: (i, 0)),        # logits (native dtype)
            pl.BlockSpec((1, 1, tile_n), lambda i: (i, 0, 0)),  # lane-dense targets
        ],
        out_specs=out_spec,
        compiler_params=pltpu.CompilerParams(
            # TODO(synk): verify on v7x (xprof) that the single parallel axis
            # actually shards across both TensorCores; if not, add an explicit
            # size-2 leading grid axis that splits N per core.
            dimension_semantics=("parallel",),
            vmem_limit_bytes=vmem_limit,
        ),
        cost_estimate=cost,
    )(inputs, t3d)

    if reduce:
        return jnp.sum(out) / jnp.float32(n)
    return out.reshape(n_pad)[:n]


def focal_loss_ref(inputs, targets, *, alpha=1.0, gamma=2.0, reduce=True):
    """Pure-JAX reference matching torch semantics."""
    logp = jax.nn.log_softmax(inputs.astype(jnp.float32), axis=-1)
    ce = -jnp.take_along_axis(logp, targets[:, None].astype(jnp.int32), axis=-1)[:, 0]
    pt = jnp.exp(-ce)
    fl = alpha * (1.0 - pt) ** gamma * ce
    return jnp.mean(fl) if reduce else fl


if __name__ == "__main__":
    key = jax.random.PRNGKey(0)
    k1, k2, k3, k4, k5, k6 = jax.random.split(key, 6)

    # Case 1: default FocalLoss() config, small (N, C) logits
    N, C = 8, 32
    inputs = jax.random.normal(k1, (N, C), dtype=jnp.float32)
    targets = jax.random.randint(k2, (N,), 0, C, dtype=jnp.int32)

    loss = jax.block_until_ready(
        focal_loss(inputs, targets, alpha=1.0, gamma=2.0, reduce=True)
    )
    ref = focal_loss_ref(inputs, targets, alpha=1.0, gamma=2.0, reduce=True)
    assert jnp.allclose(loss, ref, atol=1e-5, rtol=1e-5), (loss, ref)

    per = jax.block_until_ready(focal_loss(inputs, targets, reduce=False))
    per_ref = focal_loss_ref(inputs, targets, reduce=False)
    assert jnp.allclose(per, per_ref, atol=1e-5, rtol=1e-5), (per, per_ref)

    # Case 2: N not a multiple of 8 exercises the padded-row mask + true-N mean
    N2, C2 = 20, 32
    inputs2 = jax.random.normal(k3, (N2, C2), dtype=jnp.float32)
    targets2 = jax.random.randint(k4, (N2,), 0, C2, dtype=jnp.int32)

    loss2 = jax.block_until_ready(focal_loss(inputs2, targets2))
    ref2 = focal_loss_ref(inputs2, targets2)
    assert jnp.allclose(loss2, ref2, atol=1e-5, rtol=1e-5), (loss2, ref2)

    per2 = jax.block_until_ready(focal_loss(inputs2, targets2, reduce=False))
    per2_ref = focal_loss_ref(inputs2, targets2, reduce=False)
    assert jnp.allclose(per2, per2_ref, atol=1e-5, rtol=1e-5), (per2, per2_ref)

    # Case 3: multi-block grid (forced small tile) exercises per-block partial
    # sums, lane-dense targets per block, and the partial last block mask.
    N3, C3 = 50, 32
    inputs3 = jax.random.normal(k5, (N3, C3), dtype=jnp.float32)
    targets3 = jax.random.randint(k6, (N3,), 0, C3, dtype=jnp.int32)

    loss3 = jax.block_until_ready(focal_loss(inputs3, targets3, _max_rows=16))
    ref3 = focal_loss_ref(inputs3, targets3)
    assert jnp.allclose(loss3, ref3, atol=1e-5, rtol=1e-5), (loss3, ref3)

    per3 = jax.block_until_ready(focal_loss(inputs3, targets3, reduce=False, _max_rows=16))
    per3_ref = focal_loss_ref(inputs3, targets3, reduce=False)
    assert jnp.allclose(per3, per3_ref, atol=1e-5, rtol=1e-5), (per3, per3_ref)

    # TODO(synk): targets are int32 (torch uses int64); no ignore_index handling,
    # matching the reference FocalLoss definition.
    print("KERNEL_OK")
</pallas_src>

<mosaic_0001>
module attributes {stable_mosaic.version = 11 : i64} {
  func.func @_focal_loss_kernel(%arg0: i32, %arg1: memref<8x32xf32, #tpu.memory_space<vmem>>, %arg2: memref<1x1x8xi32, #tpu.memory_space<vmem>>, %arg3: memref<1x1x1xf32, #tpu.memory_space<vmem>>) attributes {dimension_semantics = [#tpu.dimension_semantics<parallel>], iteration_bounds = array<i64: 1>, scalar_prefetch = 0 : i64, scratch_operands = 0 : i64, tpu.core_type = #tpu.core_type<tc>, window_params = [{transform_indices = @transform_0, window_bounds = array<i64: 8, 32>}, {transform_indices = @transform_1, window_bounds = array<i64: 1, 1, 8>}, {transform_indices = @transform_2, window_bounds = array<i64: 1, 1, 1>}]} {
    %c0 = arith.constant 0 : index
    %c0_0 = arith.constant 0 : index
    %0 = vector.load %arg1[%c0, %c0_0] : memref<8x32xf32, #tpu.memory_space<vmem>>, vector<8x32xf32>
    %c0_1 = arith.constant 0 : index
    %c0_2 = arith.constant 0 : index
    %c0_3 = arith.constant 0 : index
    %1 = vector.load %arg2[%c0_1, %c0_2, %c0_3] : memref<1x1x8xi32, #tpu.memory_space<vmem>>, vector<1x1x8xi32>
    %2 = vector.shape_cast %1 : vector<1x1x8xi32> to vector<1x8xi32>
    %3 = tpu.transpose %2, [1, 0] : vector<1x8xi32> -> vector<8x1xi32>
    %c8_i32 = arith.constant 8 : i32
    %4 = arith.muli %arg0, %c8_i32 : i32
    %5 = tpu.iota {dimensions = array<i32: 0>} : vector<8x1xi32>
    %6 = vector.broadcast %4 : i32 to vector<8x1xi32>
    %7 = arith.addi %6, %5 : vector<8x1xi32>
    %c8_i32_4 = arith.constant 8 : i32
    %8 = vector.broadcast %c8_i32_4 : i32 to vector<8x1xi32>
    %9 = arith.cmpi slt, %7, %8 : vector<8x1xi32>
    %cst = arith.constant dense<0xFF800000> : vector<8xf32>
    %10 = vector.multi_reduction <maximumf>, %0, %cst [1] : vector<8x32xf32> to vector<8xf32>
    %11 = vector.shape_cast %10 : vector<8xf32> to vector<8x1xf32>
    %12 = vector.broadcast %11 : vector<8x1xf32> to vector<8x32xf32>
    %13 = arith.subf %0, %12 : vector<8x32xf32>
    %14 = math.exp %13 : vector<8x32xf32>
    %cst_5 = arith.constant dense<0.000000e+00> : vector<8xf32>
    %15 = vector.multi_reduction <add>, %14, %cst_5 [1] : vector<8x32xf32> to vector<8xf32>
    %16 = vector.shape_cast %15 : vector<8xf32> to vector<8x1xf32>
    %17 = math.log %16 : vector<8x1xf32>
    %18 = arith.addf %11, %17 : vector<8x1xf32>
    %19 = tpu.iota {dimensions = array<i32: 1>} : vector<8x32xi32>
    %20 = vector.broadcast %3 : vector<8x1xi32> to vector<8x32xi32>
    %21 = arith.cmpi eq, %19, %20 : vector<8x32xi32>
    %cst_6 = arith.constant 0.000000e+00 : f32
    %22 = vector.broadcast %cst_6 : f32 to vector<8x32xf32>
    %23 = arith.select %21, %0, %22 : vector<8x32xi1>, vector<8x32xf32>
    %cst_7 = arith.constant dense<0.000000e+00> : vector<8xf32>
    %24 = vector.multi_reduction <add>, %23, %cst_7 [1] : vector<8x32xf32> to vector<8xf32>
    %25 = vector.shape_cast %24 : vector<8xf32> to vector<8x1xf32>
    %26 = arith.subf %18, %25 : vector<8x1xf32>
    %cst_8 = arith.constant 0.000000e+00 : f32
    %27 = vector.broadcast %cst_8 : f32 to vector<8x1xf32>
    %28 = arith.maximumf %26, %27 : vector<8x1xf32>
    %cst_9 = arith.constant 0.000000e+00 : f32
    %29 = vector.broadcast %cst_9 : f32 to vector<8x1xf32>
    %30 = arith.subf %29, %28 : vector<8x1xf32>
    %31 = math.exp %30 : vector<8x1xf32>
    %cst_10 = arith.constant 1.000000e+00 : f32
    %32 = vector.broadcast %cst_10 : f32 to vector<8x1xf32>
    %33 = arith.subf %32, %31 : vector<8x1xf32>
    %cst_11 = arith.constant 1.000000e+00 : f32
    %34 = vector.broadcast %cst_11 : f32 to vector<8x1xf32>
    %35 = arith.mulf %34, %33 : vector<8x1xf32>
    %36 = arith.mulf %35, %33 : vector<8x1xf32>
    %cst_12 = arith.constant 1.000000e+00 : f32
    %37 = vector.broadcast %cst_12 : f32 to vector<8x1xf32>
    %38 = arith.mulf %37, %36 : vector<8x1xf32>
    %39 = arith.mulf %38, %28 : vector<8x1xf32>
    %cst_13 = arith.constant 0.000000e+00 : f32
    %40 = vector.broadcast %cst_13 : f32 to vector<8x1xf32>
    %41 = arith.select %9, %39, %40 : vector<8x1xi1>, vector<8x1xf32>
    %42 = vector.shape_cast %41 : vector<8x1xf32> to vector<1x8x1xf32>
    %cst_14 = arith.constant dense<0.000000e+00> : vector<1xf32>
    %43 = vector.multi_reduction <add>, %42, %cst_14 [1, 2] : vector<1x8x1xf32> to vector<1xf32>
    %44 = vector.shape_cast %43 : vector<1xf32> to vector<1x1x1xf32>
    %45 = vector.extract %44[0, 0, 0] : f32 from vector<1x1x1xf32>
    %46 = vector.broadcast %45 : f32 to vector<1x1xf32>
    %47 = vector.shape_cast %46 : vector<1x1xf32> to vector<1x1x1xf32>
    %c0_15 = arith.constant 0 : index
    %c0_16 = arith.constant 0 : index
    %c0_17 = arith.constant 0 : index
    %48 = vector.load %arg3[%c0_15, %c0_16, %c0_17] : memref<1x1x1xf32, #tpu.memory_space<vmem>>, vector<1x1x1xf32>
    tpu.vector_store %arg3[%c0_15, %c0_16, %c0_17], %47 {strides = array<i32>} : memref<1x1x1xf32, #tpu.memory_space<vmem>>, vector<1x1x1xf32>,
    return
  }
  func.func @transform_0(%arg0: i32) -> (i32, i32) {
    %c0_i32 = arith.constant 0 : i32
    %c0_i32_0 = arith.constant 0 : i32
    return %arg0, %c0_i32 : i32, i32
  }
  func.func @transform_1(%arg0: i32) -> (i32, i32, i32) {
    %c0_i32 = arith.constant 0 : i32
    %c0_i32_0 = arith.constant 0 : i32
    %c0_i32_1 = arith.constant 0 : i32
    return %arg0, %c0_i32, %c0_i32_0 : i32, i32, i32
  }
  func.func @transform_2(%arg0: i32) -> (i32, i32, i32) {
    %c0_i32 = arith.constant 0 : i32
    %c0_i32_0 = arith.constant 0 : i32
    %c0_i32_1 = arith.constant 0 : i32
    return %arg0, %c0_i32, %c0_i32_0 : i32, i32, i32
  }
}

</mosaic_0001>

<bundles_post_ra>
// kernel: tpu_custom_call.1
= control target key start
LH: loop header
LB: loop body
LE: loop exit
PB: predicated region body
PF: predicated region fallthrough
CT: control target
= control target key end

     0   :  { %7 = vsyncpa [#allocation3], 0  ;;  %s267_s0 = inlined_call_operand.hbm [shape: f32[8,32], index: 0, kind: input, shape index: {}]   ;;  %s268_s1 = inlined_call_operand.hbm [shape: s32[1,1,8], index: 1, kind: input, shape index: {}]   ;;  %s269_s2 = inlined_call_operand.hbm [shape: f32[1,1,1], index: 2, kind: output, shape index: {}]  }
   0x1   :  { %8 = vsyncpa [#allocation6], 0 }
   0x2   :  { %9 = vsyncpa [#allocation4], 0  ;;  %s15_s11 = sshll.u32 %s267_s0, 4  ;;  %s236_s12 = smov [#allocation2]   ;;  %s16_s11 = int_to_ptr.hbm [resolvable:$true] %s15_s11 }
   0x3   :  { %s17_s13 = sshll.u32 %s236_s12, 4  ;;  %s26_s16 = sshll.u32 %s268_s1, 4  ;;  %s18_s13 = int_to_ptr.vmem [resolvable:$true] %s17_s13  ;;  %s27_s16 = int_to_ptr.hbm [resolvable:$true] %s26_s16 }
   0x4   :  { %20 = dma.hbm_to_vmem [thread:$0]  %s16_s11, 128, %s18_s13, [#allocation3]  }
   0x5   :  { %s237_s17 = smov [#allocation5]  }
   0x6   :  { %s28_s18 = sshll.u32 %s237_s17, 4  ;;  %s29_s18 = int_to_ptr.vmem [resolvable:$true] %s28_s18 }
   0x7   :  { %31 = dma.hbm_to_vmem [thread:$0]  %s27_s16, 16, %s29_s18, [#allocation6]  }
   0x8   :  { %230 = dma.done.wait [#allocation3], 128  }
   0x9   :  { %231 = vsyncadd [#allocation3], 4294967168 }
   0xa   :  { %232 = dma.done.wait [#allocation6], 16  }
   0xb   :  { %233 = vsyncadd [#allocation6], 4294967280  ;;  %vm80_vm0 = vcmask 261120   ;;  %v40_v0 = vld [vmem:[#allocation2] sm:$0xff]  ;;  %v41_v2 = vld [vmem:[#allocation5] sm:$0x1]  ;;  %v93_v10 = vlaneseq }
   0xc   :  { %v81_v1 = vsel %vm80_vm0, %v40_v0, -inf  ;;  %v238_v3 = vmov 0   ;;  %vm112_vm2 = vcmask 7168   ;;  %s239_s0 = smov [#allocation7]   ;;  %s133_s21 = sshll.u32 %s269_s2, 4  ;;  %vm124_vm3 = vcmask 0   ;;  %s134_s21 = int_to_ptr.hbm [resolvable:$true] %s133_s21 }
   0xd   :  { %82 = vmax.xlane.f32.xlu0 %v81_v1  ;;  %150 = vset.pattern.permute.xlu1 %v238_v3  ;;  %v94_v11 = vand.u32 127, %v93_v10  ;;  %s131_s1 = sshll.u32 %s239_s0, 4  ;;  %s132_s1 = int_to_ptr.vmem [resolvable:$true] %s131_s1 }
  0x36   :  { %42 = vxpose.xlu0.b32.start.end [1/1] (short) (narrow) %v41_v2, 8 }
  0x80   :  { %v83_v4 = vpop.xlane.xlu0 %82 }
  0x81   :  { %v84_v6 = vsub.f32 %v40_v0, %v83_v4 }
  0x83   :  { %v85_v7 = vmul.f32 1.442695, %v84_v6 }
  0x85   :  { %152 = vpow2.f32 %v85_v7 }
  0x8b   :  { %v153_v8 = vpop.eup %152 }
  0x8c   :  { %v87_v9 = vsel %vm80_vm0, %v153_v8, 0.0 }
  0x9d   :  { %151 = vset.pattern.permute.xlu0 %v238_v3 }
  0xda   :  { %v58_v5 = vpop.trf.xlu0 }
  0xdb   :  { %96 = vperm.xlu1 %150, %v58_v5  }
 0x105   :  { %88 = vadd.xlane.f32.xlu1 %v87_v9 }
 0x14d   :  { %v97_v12 = vpop.permute.xlu1 %96 }
 0x14e   :  { %vm98_vm1 = vcmp.eq.s32.totalorder %v94_v11, %v97_v12 }
 0x14f   :  { %v99_v13 = vsel %vm98_vm1, %v40_v0, 0.0 }
 0x150   :  { %v100_v14 = vsel %vm80_vm0, %v99_v13, 0.0 }
 0x151   :  { %101 = vadd.xlane.f32.xlu2 %v100_v14 }
 0x178   :  { %v89_v15 = vpop.xlane.xlu1 %88 }
 0x179   :  { %154 = vlog2.f32 %v89_v15 }
 0x17f   :  { %v155_v16 = vpop.eup %154 }
 0x180   :  { %v91_v17 = vmul.f32 0.6931472, %v155_v16 }
 0x182   :  { %v92_v18 = vadd.f32 %v91_v17, %v83_v4 }
 0x1c4   :  { %v102_v19 = vpop.xlane.xlu2 %101 }
 0x1c5   :  { %v103_v20 = vsub.f32 %v92_v18, %v102_v19 }
 0x1c7   :  { %v104_v21 = vmax.f32 %v103_v20, 0.0 }
 0x1c9   :  { %v105_v22 = vsub.f32 0.0, %v104_v21 }
 0x1cb   :  { %v106_v23 = vmul.f32 1.442695, %v105_v22 }
 0x1cd   :  { %156 = vpow2.f32 %v106_v23 }
 0x1d3   :  { %v157_v24 = vpop.eup %156 }
 0x1d4   :  { %v108_v25 = vsub.f32 1.0, %v157_v24 }
 0x1d6   :  { %v109_v26 = vmul.f32 %v108_v25, %v108_v25 }
 0x1d8   :  { %v110_v27 = vmul.f32 %v109_v26, %v104_v21 }
 0x1da   :  { %v113_v28 = vsel %vm112_vm2, %v110_v27, 0.0 }
 0x1db   :  { %114 = vadd.xlane.f32.xlu2 %v113_v28 }
 0x24e   :  { %v115_v29 = vpop.xlane.xlu2 %114 }
 0x24f   :  { %v116_v30 = vrot.slane %v115_v29, 4 }
 0x251   :  { %v117_v31 = vadd.f32 %v116_v30, %v115_v29 }
 0x253   :  { %v118_v32 = vrot.slane %v117_v31, 2 }
 0x255   :  { %v119_v33 = vadd.f32 %v118_v32, %v117_v31 }
 0x257   :  { %v120_v34 = vrot.slane %v119_v33, 1 }
 0x259   :  { %v121_v35 = vadd.f32 %v120_v34, %v119_v33 }
 0x25b   :  { %144 = vpush %v121_v35 }
 0x28c   :  { %s145_s22 = spop %144 }
 0x28d   :  { %v123_v36 = vstv %s145_s22 }
 0x28e   :  { %125 = vst.msk [vmem:[#allocation7] sm:$0x1] %vm124_vm3, %v123_v36 }
 0x28f   :  { %136 = dma.vmem_to_hbm [thread:$0]  %s132_s1, 16, %s134_s21, [#allocation4]  }
 0x290   :  { %234 = dma.done.wait [#allocation4], 16  }
 0x291   :  { %235 = vsyncadd [#allocation4], 4294967280 }
 0x292   :  { %141 = vsyncpa [#allocation3], 1 }
 0x293   :  { %142 = vsyncpa [#allocation6], 1 }
 0x294   :  { %143 = vsyncpa [#allocation4], 1 }

</bundles_post_ra>
